<compile_context>
chip_gen: v7x
topology: tpu7x:2x2x1
jax: 0.10.0
libtpu: 0.0.40
codegen_flags: <defaults>
</compile_context>

<pallas_src>
import functools

import jax
import jax.numpy as jnp
from jax.experimental import pallas as pl
from jax.experimental.pallas import tpu as pltpu

IN_FEATURES = 100
IN_PAD = 128            # 100 -> 128 (one full lane tile on K)
HID = 256
OUT_FEATURES = 784
LEAKY_SLOPE = 0.01      # PyTorch nn.LeakyReLU default


def _round_up(x, m):
    return (x + m - 1) // m * m


def _choose_batch_tiling(B, tile_b):
    """Pick (batch_tile, padded_batch).

    - tile is a multiple of 8 sublanes
    - a large single-tile batch is split into 2 grid steps so the "parallel"
      batch axis can shard across v7x's two TensorCores (near-free on v5e/v6e)
    - multi-tile batches use the largest tile <= tile_b
    """
    if B <= tile_b:
        tb = _round_up(B, 8)
        if tb >= 1024:                       # worth 2 steps for v7x megacore
            tb = _round_up((tb + 1) // 2, 8)
            return tb, 2 * tb
        return tb, tb
    ntiles = -(-B // tile_b)                 # >= 2
    tb = _round_up(-(-B // ntiles), 8)
    return tb, tb * ntiles


def generator_kernel(x_ref, w1_ref, b1_ref, w2_ref, b2_ref, o_ref):
    # h = x @ W1 + b1 : bf16 operands on the MXU, f32 accumulation.
    h = jnp.dot(x_ref[...], w1_ref[...], preferred_element_type=jnp.float32)
    h = h + b1_ref[...]
    # TODO(synk): the PyTorch forward does `print(h)` on the full hidden
    # tensor; no clean in-kernel equivalent (pl.debug_print is scalar-only).
    # LeakyReLU in f32 on the VPU.
    h = jnp.where(h > 0.0, h, LEAKY_SLOPE * h)
    # y = h @ W2 + b2 : cast activation to bf16 for the MXU, accumulate f32.
    y = jnp.dot(h.astype(w2_ref.dtype), w2_ref[...],
                preferred_element_type=jnp.float32)
    y = y + b2_ref[...]
    # Sigmoid via the tanh identity: a single EUP op (tanh); the scale/shift
    # hide under the free VALU slots.  Exact (no approx reciprocal).
    o_ref[...] = (0.5 * jnp.tanh(0.5 * y) + 0.5).astype(o_ref.dtype)


def prepare_params(w1, b1, w2, b2):
    """One-time host-side prep: pad K (zeros) + cast weights to bf16.

    w1: (100, 256) -> (128, 256) bf16   (padded rows are exact zeros)
    b1: (256,) or (1,256) -> (1, 256) f32
    w2: (256, 784) -> (256, 784) bf16   (no output padding anymore)
    b2: (784,) or (1,784) -> (1, 784) f32
    """
    w1 = jnp.asarray(w1)
    w2 = jnp.asarray(w2)
    b1 = jnp.asarray(b1).reshape(1, HID)
    b2 = jnp.asarray(b2).reshape(1, OUT_FEATURES)

    w1p = jnp.zeros((IN_PAD, HID), jnp.bfloat16)
    w1p = w1p.at[:IN_FEATURES, :].set(w1.astype(jnp.bfloat16))
    b1p = b1.astype(jnp.float32)

    w2p = w2.astype(jnp.bfloat16)
    b2p = b2.astype(jnp.float32)
    return w1p, b1p, w2p, b2p


@functools.partial(jax.jit, static_argnames=("tile_b", "out_dtype"))
def generator_forward(x, w1p, b1p, w2p, b2p, *, tile_b=1024,
                      out_dtype=jnp.float32):
    """x: (B, 100) f32/bf16.  Params from prepare_params.  Returns (B, 784)."""
    B = x.shape[0]
    tb, Bp = _choose_batch_tiling(B, tile_b)
    ntiles = Bp // tb

    # Pad x on K (100 -> 128) and on batch, cast to bf16 for the MXU.  Done
    # inside the same jit as the pallas_call so XLA fuses the copy.
    xp = jnp.pad(x.astype(jnp.bfloat16),
                 ((0, Bp - B), (0, IN_PAD - IN_FEATURES)))

    out_itemsize = jnp.dtype(out_dtype).itemsize
    flops = 2 * Bp * (IN_PAD * HID + HID * OUT_FEATURES)
    transcendentals = Bp * OUT_FEATURES                        # one tanh/elem
    bytes_accessed = (Bp * IN_PAD * 2                          # x (bf16)
                      + IN_PAD * HID * 2 + HID * 4             # w1 + b1
                      + HID * OUT_FEATURES * 2 + OUT_FEATURES * 4  # w2 + b2
                      + Bp * OUT_FEATURES * out_itemsize)      # out

    out = pl.pallas_call(
        generator_kernel,
        out_shape=jax.ShapeDtypeStruct((Bp, OUT_FEATURES), out_dtype),
        grid_spec=pltpu.PrefetchScalarGridSpec(
            num_scalar_prefetch=0,
            grid=(ntiles,),
            in_specs=[
                pl.BlockSpec((tb, IN_PAD), lambda i: (i, 0)),          # x tile
                pl.BlockSpec((IN_PAD, HID), lambda i: (0, 0)),         # w1 resident
                pl.BlockSpec((1, HID), lambda i: (0, 0)),              # b1 resident
                pl.BlockSpec((HID, OUT_FEATURES), lambda i: (0, 0)),   # w2 resident
                pl.BlockSpec((1, OUT_FEATURES), lambda i: (0, 0)),     # b2 resident
            ],
            # Block last dim equals the full array last dim (784), so no
            # lane-padding is required and there is no wrapper slice copy.
            out_specs=pl.BlockSpec((tb, OUT_FEATURES), lambda i: (i, 0)),
        ),
        compiler_params=pltpu.CompilerParams(
            dimension_semantics=("parallel",),
            vmem_limit_bytes=32 * 1024 * 1024),
        cost_estimate=pl.CostEstimate(
            flops=flops,
            transcendentals=transcendentals,
            bytes_accessed=bytes_accessed),
    )(xp, w1p, b1p, w2p, b2p)

    # Only drop batch padding (no output-feature padding anymore).  Fused by
    # the surrounding jit; a no-op when B is already a tile multiple.
    return out if Bp == B else out[:B]


def _init_linear(key, fan_in, fan_out):
    # Deterministic init mimicking nn.Linear's U(-1/sqrt(fan_in), 1/sqrt(fan_in)).
    kw, kb = jax.random.split(key)
    bound = 1.0 / jnp.sqrt(jnp.float32(fan_in))
    w = jax.random.uniform(kw, (fan_in, fan_out), jnp.float32, -bound, bound)
    b = jax.random.uniform(kb, (1, fan_out), jnp.float32, -bound, bound)
    return w, b


if __name__ == "__main__":
    key = jax.random.PRNGKey(0)
    kx, k1, k2 = jax.random.split(key, 3)

    B = 8
    x = jax.random.normal(kx, (B, IN_FEATURES), jnp.float32)
    w1, b1 = _init_linear(k1, IN_FEATURES, HID)
    w2, b2 = _init_linear(k2, HID, OUT_FEATURES)

    w1p, b1p, w2p, b2p = prepare_params(w1, b1, w2, b2)
    out = generator_forward(x, w1p, b1p, w2p, b2p)
    out = jax.block_until_ready(out)

    # Reference with the same bf16 weight/activation quantization and f32
    # accumulation (intentional divergence from a pure-f32 torch forward).
    xb = x.astype(jnp.bfloat16)
    h_ref = jnp.dot(xb, w1.astype(jnp.bfloat16),
                    preferred_element_type=jnp.float32) + b1
    h_ref = jnp.where(h_ref > 0, h_ref, LEAKY_SLOPE * h_ref)
    y_ref = jnp.dot(h_ref.astype(jnp.bfloat16), w2.astype(jnp.bfloat16),
                    preferred_element_type=jnp.float32) + b2
    ref = jax.nn.sigmoid(y_ref)

    assert out.shape == (B, OUT_FEATURES)
    assert jnp.allclose(out, ref, atol=5e-3, rtol=5e-3), float(
        jnp.max(jnp.abs(out - ref)))

    print("KERNEL_OK")
</pallas_src>

<mosaic_0001>
module attributes {stable_mosaic.version = 11 : i64} {
  func.func @generator_kernel(%arg0: i32, %arg1: memref<8x128xbf16, #tpu.memory_space<vmem>>, %arg2: memref<128x256xbf16, #tpu.memory_space<vmem>>, %arg3: memref<1x256xf32, #tpu.memory_space<vmem>>, %arg4: memref<256x784xbf16, #tpu.memory_space<vmem>>, %arg5: memref<1x784xf32, #tpu.memory_space<vmem>>, %arg6: memref<8x784xf32, #tpu.memory_space<vmem>>) attributes {dimension_semantics = [#tpu.dimension_semantics<parallel>], iteration_bounds = array<i64: 1>, scalar_prefetch = 0 : i64, scratch_operands = 0 : i64, tpu.core_type = #tpu.core_type<tc>, window_params = [{transform_indices = @transform_0, window_bounds = array<i64: 8, 128>}, {pipeline_mode = #tpu.pipeline_mode<synchronous>, transform_indices = @transform_1, window_bounds = array<i64: 128, 256>}, {pipeline_mode = #tpu.pipeline_mode<synchronous>, transform_indices = @transform_2, window_bounds = array<i64: 1, 256>}, {pipeline_mode = #tpu.pipeline_mode<synchronous>, transform_indices = @transform_3, window_bounds = array<i64: 256, 784>}, {pipeline_mode = #tpu.pipeline_mode<synchronous>, transform_indices = @transform_4, window_bounds = array<i64: 1, 784>}, {transform_indices = @transform_5, window_bounds = array<i64: 8, 784>}]} {
    %c0 = arith.constant 0 : index
    %c0_0 = arith.constant 0 : index
    %0 = vector.load %arg1[%c0, %c0_0] : memref<8x128xbf16, #tpu.memory_space<vmem>>, vector<8x128xbf16>
    %c0_1 = arith.constant 0 : index
    %c0_2 = arith.constant 0 : index
    %1 = vector.load %arg2[%c0_1, %c0_2] : memref<128x256xbf16, #tpu.memory_space<vmem>>, vector<128x256xbf16>
    %cst = arith.constant dense<0.000000e+00> : vector<8x256xf32>
    %2 = tpu.matmul %0, %1, %cst {dimension_numbers = #tpu.dot_dimension_numbers<[1], [0], [0], [1], [0, 0, 1, 1], [], []>} : vector<8x128xbf16>, vector<128x256xbf16>, vector<8x256xf32> -> vector<8x256xf32>
    %c0_3 = arith.constant 0 : index
    %c0_4 = arith.constant 0 : index
    %3 = vector.load %arg3[%c0_3, %c0_4] : memref<1x256xf32, #tpu.memory_space<vmem>>, vector<1x256xf32>
    %4 = vector.broadcast %3 : vector<1x256xf32> to vector<8x256xf32>
    %5 = arith.addf %2, %4 : vector<8x256xf32>
    %cst_5 = arith.constant 0.000000e+00 : f32
    %6 = vector.broadcast %cst_5 : f32 to vector<8x256xf32>
    %7 = arith.cmpf ogt, %5, %6 : vector<8x256xf32>
    %cst_6 = arith.constant 0.00999999977 : f32
    %8 = vector.broadcast %cst_6 : f32 to vector<8x256xf32>
    %9 = arith.mulf %8, %5 : vector<8x256xf32>
    %10 = arith.select %7, %5, %9 : vector<8x256xi1>, vector<8x256xf32>
    %11 = arith.truncf %10 : vector<8x256xf32> to vector<8x256xbf16>
    %c0_7 = arith.constant 0 : index
    %c0_8 = arith.constant 0 : index
    %12 = vector.load %arg4[%c0_7, %c0_8] : memref<256x784xbf16, #tpu.memory_space<vmem>>, vector<256x784xbf16>
    %cst_9 = arith.constant dense<0.000000e+00> : vector<8x784xf32>
    %13 = tpu.matmul %11, %12, %cst_9 {dimension_numbers = #tpu.dot_dimension_numbers<[1], [0], [0], [1], [0, 0, 1, 1], [], []>} : vector<8x256xbf16>, vector<256x784xbf16>, vector<8x784xf32> -> vector<8x784xf32>
    %c0_10 = arith.constant 0 : index
    %c0_11 = arith.constant 0 : index
    %14 = vector.load %arg5[%c0_10, %c0_11] : memref<1x784xf32, #tpu.memory_space<vmem>>, vector<1x784xf32>
    %15 = vector.broadcast %14 : vector<1x784xf32> to vector<8x784xf32>
    %16 = arith.addf %13, %15 : vector<8x784xf32>
    %cst_12 = arith.constant 5.000000e-01 : f32
    %17 = vector.broadcast %cst_12 : f32 to vector<8x784xf32>
    %18 = arith.mulf %17, %16 : vector<8x784xf32>
    %19 = math.tanh %18 : vector<8x784xf32>
    %cst_13 = arith.constant 5.000000e-01 : f32
    %20 = vector.broadcast %cst_13 : f32 to vector<8x784xf32>
    %21 = arith.mulf %20, %19 : vector<8x784xf32>
    %cst_14 = arith.constant 5.000000e-01 : f32
    %22 = vector.broadcast %cst_14 : f32 to vector<8x784xf32>
    %23 = arith.addf %21, %22 : vector<8x784xf32>
    %c0_15 = arith.constant 0 : index
    %c0_16 = arith.constant 0 : index
    %24 = vector.load %arg6[%c0_15, %c0_16] : memref<8x784xf32, #tpu.memory_space<vmem>>, vector<8x784xf32>
    tpu.vector_store %arg6[%c0_15, %c0_16], %23 {strides = array<i32>} : memref<8x784xf32, #tpu.memory_space<vmem>>, vector<8x784xf32>,
    return
  }
  func.func @transform_0(%arg0: i32) -> (i32, i32) {
    %c0_i32 = arith.constant 0 : i32
    %c0_i32_0 = arith.constant 0 : i32
    return %arg0, %c0_i32 : i32, i32
  }
  func.func @transform_1(%arg0: i32) -> (i32, i32) {
    %c0_i32 = arith.constant 0 : i32
    %c0_i32_0 = arith.constant 0 : i32
    %c0_i32_1 = arith.constant 0 : i32
    return %c0_i32, %c0_i32_0 : i32, i32
  }
  func.func @transform_2(%arg0: i32) -> (i32, i32) {
    %c0_i32 = arith.constant 0 : i32
    %c0_i32_0 = arith.constant 0 : i32
    %c0_i32_1 = arith.constant 0 : i32
    return %c0_i32, %c0_i32_0 : i32, i32
  }
  func.func @transform_3(%arg0: i32) -> (i32, i32) {
    %c0_i32 = arith.constant 0 : i32
    %c0_i32_0 = arith.constant 0 : i32
    %c0_i32_1 = arith.constant 0 : i32
    return %c0_i32, %c0_i32_0 : i32, i32
  }
  func.func @transform_4(%arg0: i32) -> (i32, i32) {
    %c0_i32 = arith.constant 0 : i32
    %c0_i32_0 = arith.constant 0 : i32
    %c0_i32_1 = arith.constant 0 : i32
    return %c0_i32, %c0_i32_0 : i32, i32
  }
  func.func @transform_5(%arg0: i32) -> (i32, i32) {
    %c0_i32 = arith.constant 0 : i32
    %c0_i32_0 = arith.constant 0 : i32
    return %arg0, %c0_i32 : i32, i32
  }
}

</mosaic_0001>

<bundles_post_ra>
// kernel: generator_forward.1
= control target key start
LH: loop header
LB: loop body
LE: loop exit
PB: predicated region body
PF: predicated region fallthrough
CT: control target
= control target key end

     0   :  { %v1508_v2 = vmov 0   ;;  %s1968_s0 = inlined_call_operand.vmem [shape: bf16[8,128], index: 0, kind: input, shape index: {}]   ;;  %s1969_s1 = inlined_call_operand.vmem [shape: bf16[128,256], index: 1, kind: input, shape index: {}]   ;;  %s1970_s2 = inlined_call_operand.vmem [shape: f32[1,256], index: 2, kind: input, shape index: {}]   ;;  %s1971_s3 = inlined_call_operand.vmem [shape: bf16[256,784], index: 3, kind: input, shape index: {}]   ;;  %s1972_s4 = inlined_call_operand.vmem [shape: f32[1,784], index: 4, kind: input, shape index: {}]   ;;  %s1973_s5 = inlined_call_operand.hbm [shape: f32[8,784], index: 5, kind: output, shape index: {}]  }
   0x1   :  { %v1286_v0 = vld [vmem:[%s1969_s1 + $0x4] ss:$8 sps:$4 sm:$0xff]   ;;  %v1288_v1 = vld [vmem:[%s1969_s1] ss:$8 sps:$4 sm:$0xff]   ;;  %163 = vmatprep.mubr.bf16.mxu0 %v1508_v2  ;;  %v1289_v3 = vld [vmem:[%s1969_s1 + $0x14] ss:$8 sps:$4 sm:$0xff]  }
   0x2   :  { %131 = vmatprep.subr.bf16.mxu0 %v1286_v0  ;;  %v1291_v4 = vld [vmem:[%s1969_s1 + $0x10] ss:$8 sps:$4 sm:$0xff]   ;;  %v1292_v5 = vld [vmem:[%s1969_s1 + $0x24] ss:$8 sps:$4 sm:$0xff]   ;;  %v1294_v6 = vld [vmem:[%s1969_s1 + $0x20] ss:$8 sps:$4 sm:$0xff]  }
   0x3   :  { %132 = vmatpush1.bf16.msra.mxu0 %v1288_v1  ;;  %v1295_v7 = vld [vmem:[%s1969_s1 + $0x34] ss:$8 sps:$4 sm:$0xff]   ;;  %v1297_v8 = vld [vmem:[%s1969_s1 + $0x30] ss:$8 sps:$4 sm:$0xff]   ;;  %v1310_v9 = vld [vmem:[%s1971_s3 + $0x4] ss:$28 sps:$4 sm:$0xff]  }
   0x4   :  { %133 = vmatprep.subr.bf16.mxu0 %v1289_v3  ;;  %v1298_v10 = vld [vmem:[%s1969_s1 + $0x44] ss:$8 sps:$4 sm:$0xff]   ;;  %921 = vmatprep.subr.bf16.mxu1 %v1310_v9  ;;  %v1315_v11 = vld [vmem:[%s1971_s3] ss:$28 sps:$4 sm:$0xff]   ;;  %v1321_v15 = vld [vmem:[%s1971_s3 + $0x38] ss:$28 sps:$4 sm:$0xff]  }
   0x5   :  { %v1316_v12 = vld [vmem:[%s1971_s3 + $0x3c] ss:$28 sps:$4 sm:$0xff]   ;;  %v1300_v13 = vld [vmem:[%s1969_s1 + $0x40] ss:$8 sps:$4 sm:$0xff]   ;;  %922 = vmatpush1.bf16.msra.mxu1 %v1315_v11  ;;  %v1322_v16 = vld [vmem:[%s1971_s3 + $0x74] ss:$28 sps:$4 sm:$0xff]  }
   0x6   :  { %v1301_v14 = vld [vmem:[%s1969_s1 + $0x54] ss:$8 sps:$4 sm:$0xff]   ;;  %923 = vmatprep.subr.bf16.mxu1 %v1316_v12  ;;  %v1303_v17 = vld [vmem:[%s1969_s1 + $0x50] ss:$8 sps:$4 sm:$0xff]   ;;  %v1304_v18 = vld [vmem:[%s1969_s1 + $0x64] ss:$8 sps:$4 sm:$0xff]  }
   0x7   :  { %134 = vmatpush1.bf16.msra.mxu0 %v1291_v4  ;;  %v1327_v19 = vld [vmem:[%s1971_s3 + $0x70] ss:$28 sps:$4 sm:$0xff]   ;;  %v1306_v21 = vld [vmem:[%s1969_s1 + $0x60] ss:$8 sps:$4 sm:$0xff]   ;;  %v1307_v22 = vld [vmem:[%s1969_s1 + $0x74] ss:$8 sps:$4 sm:$0xff]  }
   0x8   :  { %135 = vmatprep.subr.bf16.mxu0 %v1292_v5  ;;  %v1328_v20 = vld [vmem:[%s1971_s3 + $0xac] ss:$28 sps:$4 sm:$0xff]   ;;  %v1334_v24 = vld [vmem:[%s1971_s3 + $0xe4] ss:$28 sps:$4 sm:$0xff]   ;;  %v1309_v25 = vld [vmem:[%s1969_s1 + $0x70] ss:$8 sps:$4 sm:$0xff]  }
   0x9   :  { %924 = vmatpush1.bf16.msra.mxu1 %v1321_v15  ;;  %v1333_v23 = vld [vmem:[%s1971_s3 + $0xa8] ss:$28 sps:$4 sm:$0xff]   ;;  %v1339_v27 = vld [vmem:[%s1971_s3 + $0xe0] ss:$28 sps:$4 sm:$0xff]   ;;  %v1345_v32 = vld [vmem:[%s1971_s3 + $0x118] ss:$28 sps:$4 sm:$0xff]  }
   0xa   :  { %925 = vmatprep.subr.bf16.mxu1 %v1322_v16  ;;  %v1314_v26 = vld [vmem:[%s1971_s3 + $0xc] ss:$28 sps:$4 sm:$0xff]   ;;  %v1340_v28 = vld [vmem:[%s1971_s3 + $0x11c] ss:$28 sps:$4 sm:$0xff]   ;;  %v22_v29 = vld [vmem:[%s1968_s0] sm:$0xf] }
   0xb   :  { %136 = vmatpush1.bf16.msra.mxu0 %v1294_v6  ;;  %v1312_v30 = vld [vmem:[%s1971_s3 + $0x8] ss:$28 sps:$4 sm:$0xff]   ;;  %v1346_v33 = vld [vmem:[%s1971_s3 + $0x154] ss:$28 sps:$4 sm:$0xff]   ;;  %v1318_v34 = vld [vmem:[%s1971_s3 + $0x40] ss:$28 sps:$4 sm:$0xff]  }
   0xc   :  { %137 = vmatprep.subr.bf16.mxu0 %v1295_v7  ;;  %v1320_v31 = vld [vmem:[%s1971_s3 + $0x44] ss:$28 sps:$4 sm:$0xff]   ;;  %v1326_v35 = vld [vmem:[%s1971_s3 + $0x7c] ss:$28 sps:$4 sm:$0xff]   ;;  %v1351_v36 = vld [vmem:[%s1971_s3 + $0x150] ss:$28 sps:$4 sm:$0xff]  }
   0xd   :  { %926 = vmatpush1.bf16.msra.mxu1 %v1327_v19  ;;  %v1352_v37 = vld [vmem:[%s1971_s3 + $0x18c] ss:$28 sps:$4 sm:$0xff]   ;;  %v1324_v38 = vld [vmem:[%s1971_s3 + $0x78] ss:$28 sps:$4 sm:$0xff]   ;;  %v1358_v41 = vld [vmem:[%s1971_s3 + $0x1c4] ss:$28 sps:$4 sm:$0xff]  }
   0xe   :  { %927 = vmatprep.subr.bf16.mxu1 %v1328_v20  ;;  %v1332_v39 = vld [vmem:[%s1971_s3 + $0xb4] ss:$28 sps:$4 sm:$0xff]   ;;  %v1357_v40 = vld [vmem:[%s1971_s3 + $0x188] ss:$28 sps:$4 sm:$0xff]   ;;  %v1363_v44 = vld [vmem:[%s1971_s3 + $0x1c0] ss:$28 sps:$4 sm:$0xff]  }
   0xf   :  { %138 = vmatpush1.bf16.msra.mxu0 %v1297_v8  ;;  %v1330_v42 = vld [vmem:[%s1971_s3 + $0xb0] ss:$28 sps:$4 sm:$0xff]   ;;  %v1364_v45 = vld [vmem:[%s1971_s3 + $0x1fc] ss:$28 sps:$4 sm:$0xff]   ;;  %v1336_v46 = vld [vmem:[%s1971_s3 + $0xe8] ss:$28 sps:$4 sm:$0xff]  }
  0x10   :  { %139 = vmatprep.subr.bf16.mxu0 %v1298_v10  ;;  %v1338_v43 = vld [vmem:[%s1971_s3 + $0xec] ss:$28 sps:$4 sm:$0xff]   ;;  %v1369_v47 = vld [vmem:[%s1971_s3 + $0x1f8] ss:$28 sps:$4 sm:$0xff]   ;;  %v1344_v48 = vld [vmem:[%s1971_s3 + $0x124] ss:$28 sps:$4 sm:$0xff]  }
  0x11   :  { %928 = vmatpush1.bf16.msra.mxu1 %v1333_v23  ;;  %v1370_v49 = vld [vmem:[%s1971_s3 + $0x234] ss:$28 sps:$4 sm:$0xff]   ;;  %v1342_v50 = vld [vmem:[%s1971_s3 + $0x120] ss:$28 sps:$4 sm:$0xff]   ;;  %v1376_v53 = vld [vmem:[%s1971_s3 + $0x26c] ss:$28 sps:$4 sm:$0xff]  }
  0x12   :  { %929 = vmatprep.subr.bf16.mxu1 %v1334_v24  ;;  %v1375_v51 = vld [vmem:[%s1971_s3 + $0x230] ss:$28 sps:$4 sm:$0xff]   ;;  %v1350_v52 = vld [vmem:[%s1971_s3 + $0x15c] ss:$28 sps:$4 sm:$0xff]   ;;  %v1381_v55 = vld [vmem:[%s1971_s3 + $0x268] ss:$28 sps:$4 sm:$0xff]  }
  0x13   :  { %140 = vmatpush1.bf16.msra.mxu0 %v1300_v13  ;;  %v1348_v54 = vld [vmem:[%s1971_s3 + $0x158] ss:$28 sps:$4 sm:$0xff]   ;;  %v1382_v57 = vld [vmem:[%s1971_s3 + $0x2a4] ss:$28 sps:$4 sm:$0xff]   ;;  %v1354_v58 = vld [vmem:[%s1971_s3 + $0x190] ss:$28 sps:$4 sm:$0xff]  }
  0x14   :  { %141 = vmatprep.subr.bf16.mxu0 %v1301_v14  ;;  %v1356_v56 = vld [vmem:[%s1971_s3 + $0x194] ss:$28 sps:$4 sm:$0xff]   ;;  %v1387_v59 = vld [vmem:[%s1971_s3 + $0x2a0] ss:$28 sps:$4 sm:$0xff]   ;;  %v1362_v60 = vld [vmem:[%s1971_s3 + $0x1cc] ss:$28 sps:$4 sm:$0xff]  }
  0x15   :  { %930 = vmatpush1.bf16.msra.mxu1 %v1339_v27  ;;  %v1388_v61 = vld [vmem:[%s1971_s3 + $0x2dc] ss:$28 sps:$4 sm:$0xff]   ;;  %v1360_v62 = vld [vmem:[%s1971_s3 + $0x1c8] ss:$28 sps:$4 sm:$0xff]   ;;  %v1380_v4 = vld [vmem:[%s1971_s3 + $0x274] ss:$28 sps:$4 sm:$0xff]  }
  0x16   :  { %931 = vmatprep.subr.bf16.mxu1 %v1340_v28  ;;  %v1393_v63 = vld [vmem:[%s1971_s3 + $0x2d8] ss:$28 sps:$4 sm:$0xff]   ;;  %v1368_v0 = vld [vmem:[%s1971_s3 + $0x204] ss:$28 sps:$4 sm:$0xff]  }
  0x17   :  { %142 = vmatpush1.bf16.msra.mxu0 %v1303_v17  ;;  %v1366_v1 = vld [vmem:[%s1971_s3 + $0x200] ss:$28 sps:$4 sm:$0xff]   ;;  %v1372_v3 = vld [vmem:[%s1971_s3 + $0x238] ss:$28 sps:$4 sm:$0xff]  }
  0x18   :  { %143 = vmatprep.subr.bf16.mxu0 %v1304_v18  ;;  %v1374_v2 = vld [vmem:[%s1971_s3 + $0x23c] ss:$28 sps:$4 sm:$0xff]  }
  0x19   :  { %932 = vmatpush1.bf16.msra.mxu1 %v1345_v32 }
  0x1a   :  { %933 = vmatprep.subr.bf16.mxu1 %v1346_v33 }
  0x1b   :  { %144 = vmatpush1.bf16.msra.mxu0 %v1306_v21 }
  0x1c   :  { %145 = vmatprep.subr.bf16.mxu0 %v1307_v22 }
  0x1d   :  { %934 = vmatpush1.bf16.msra.mxu1 %v1351_v36 }
  0x1e   :  { %935 = vmatprep.subr.bf16.mxu1 %v1352_v37 }
  0x1f   :  { %146 = vmatpush1.bf16.msra.mxu0 %v1309_v25 }
  0x20   :  { %962 = vmatprep.subr.bf16.mxu0 %v1314_v26 }
  0x21   :  { %936 = vmatpush1.bf16.msra.mxu1 %v1357_v40 }
  0x22   :  { %164 = vmatmul.mubr.bf16.vlgmr.msra.gmra.mrb[0].mxu0 %v22_v29  ;;  %937 = vmatprep.subr.bf16.mxu1 %v1358_v41 }
  0x23   :  { %963 = vmatpush1.bf16.msra.mxu0 %v1312_v30 }
  0x24   :  { %964 = vmatprep.subr.bf16.mxu0 %v1320_v31 }
  0x25   :  { %938 = vmatpush1.bf16.msra.mxu1 %v1363_v44 }
  0x26   :  { %939 = vmatprep.subr.bf16.mxu1 %v1364_v45 }
  0x27   :  { %965 = vmatpush1.bf16.msra.mxu0 %v1318_v34 }
  0x28   :  { %966 = vmatprep.subr.bf16.mxu0 %v1326_v35 }
  0x29   :  { %940 = vmatpush1.bf16.msra.mxu1 %v1369_v47 }
  0x2a   :  { %941 = vmatprep.subr.bf16.mxu1 %v1370_v49 }
  0x2b   :  { %967 = vmatpush1.bf16.msra.mxu0 %v1324_v38 }
  0x2c   :  { %968 = vmatprep.subr.bf16.mxu0 %v1332_v39 }
  0x2d   :  { %942 = vmatpush1.bf16.msra.mxu1 %v1375_v51 }
  0x2e   :  { %943 = vmatprep.subr.bf16.mxu1 %v1376_v53 }
  0x2f   :  { %969 = vmatpush1.bf16.msra.mxu0 %v1330_v42 }
  0x30   :  { %970 = vmatprep.subr.bf16.mxu0 %v1338_v43 }
  0x31   :  { %944 = vmatpush1.bf16.msra.mxu1 %v1381_v55 }
  0x32   :  { %945 = vmatprep.subr.bf16.mxu1 %v1382_v57 }
  0x33   :  { %971 = vmatpush1.bf16.msra.mxu0 %v1336_v46 }
  0x34   :  { %972 = vmatprep.subr.bf16.mxu0 %v1344_v48 }
  0x35   :  { %946 = vmatpush1.bf16.msra.mxu1 %v1387_v59 }
  0x36   :  { %947 = vmatprep.subr.bf16.mxu1 %v1388_v61 }
  0x37   :  { %973 = vmatpush1.bf16.msra.mxu0 %v1342_v50 }
  0x38   :  { %974 = vmatprep.subr.bf16.mxu0 %v1350_v52 }
  0x39   :  { %948 = vmatpush1.bf16.msra.mxu1 %v1393_v63 }
  0x3b   :  { %975 = vmatpush1.bf16.msra.mxu0 %v1348_v54 }
  0x3c   :  { %976 = vmatprep.subr.bf16.mxu0 %v1356_v56 }
  0x3f   :  { %977 = vmatpush1.bf16.msra.mxu0 %v1354_v58 }
  0x40   :  { %978 = vmatprep.subr.bf16.mxu0 %v1362_v60 }
  0x43   :  { %979 = vmatpush1.bf16.msra.mxu0 %v1360_v62 }
  0x44   :  { %980 = vmatprep.subr.bf16.mxu0 %v1368_v0 }
  0x47   :  { %981 = vmatpush1.bf16.msra.mxu0 %v1366_v1 }
  0x48   :  { %982 = vmatprep.subr.bf16.mxu0 %v1374_v2 }
  0x49   :  { %10 = vsyncpa [#allocation3], 0  ;;  %v1378_v5 = vld [vmem:[%s1971_s3 + $0x270] ss:$28 sps:$4 sm:$0xff]   ;;  %v1384_v7 = vld [vmem:[%s1971_s3 + $0x2a8] ss:$28 sps:$4 sm:$0xff]   ;;  %v41_v20 = vlaneseq }
  0x4a   :  { %v1386_v6 = vld [vmem:[%s1971_s3 + $0x2ac] ss:$28 sps:$4 sm:$0xff]   ;;  %v1392_v8 = vld [vmem:[%s1971_s3 + $0x2e4] ss:$28 sps:$4 sm:$0xff]   ;;  %v1394_v10 = vld [vmem:[%s1971_s3 + $0x314] ss:$28 sps:$4 sm:$0xff]  }
  0x4b   :  { %983 = vmatpush1.bf16.msra.mxu0 %v1372_v3  ;;  %v1390_v9 = vld [vmem:[%s1971_s3 + $0x2e0] ss:$28 sps:$4 sm:$0xff]   ;;  %v1396_v12 = vld [vmem:[%s1971_s3 + $0x318] ss:$28 sps:$4 sm:$0xff]   ;;  %v1399_v13 = vld [vmem:[%s1971_s3 + $0x310] ss:$28 sps:$4 sm:$0xff]   ;;  %949 = vmatprep.subr.bf16.mxu1 %v1394_v10 }
  0x4c   :  { %984 = vmatprep.subr.bf16.mxu0 %v1380_v4  ;;  %v1398_v11 = vld [vmem:[%s1971_s3 + $0x31c] ss:$28 sps:$4 sm:$0xff]   ;;  %950 = vmatpush1.bf16.msra.mxu1 %v1399_v13  ;;  %v1400_v14 = vld [vmem:[%s1971_s3 + $0x34c] ss:$28 sps:$4 sm:$0xff]   ;;  %v1404_v15 = vld [vmem:[%s1971_s3 + $0x354] ss:$28 sps:$4 sm:$0xff]  }
  0x4d   :  { %v1402_v16 = vld [vmem:[%s1971_s3 + $0x350] ss:$28 sps:$4 sm:$0xff]   ;;  %v1405_v17 = vld [vmem:[%s1971_s3 + $0x348] ss:$28 sps:$4 sm:$0xff]   ;;  %951 = vmatprep.subr.bf16.mxu1 %v1400_v14  ;;  %v1409_v19 = vld [vmem:[%s1971_s3 + $0x1d8] ss:$28 sps:$4 sm:$0xff]  }
  0x4e   :  { %v1408_v18 = vld [vmem:[%s1971_s3 + $0x14] ss:$28 sps:$4 sm:$0xff]   ;;  %v1789_v21 = vshrl.u32 %v41_v20, 7  ;;  %v39_v23 = vld [vmem:[%s1970_s2] sm:$0x3]  ;;  %vm1118_vm2 = vcmask 130048  }
  0x4f   :  { %985 = vmatpush1.bf16.msra.mxu0 %v1378_v5  ;;  %v1406_v38 = vld [vmem:[%s1971_s3 + $0x10] ss:$28 sps:$4 sm:$0xff]   ;;  %v1410_v39 = vld [vmem:[%s1971_s3 + $0x18] ss:$28 sps:$4 sm:$0xff]   ;;  %v1411_v43 = vld [vmem:[%s1971_s3 + $0x48] ss:$28 sps:$4 sm:$0xff]  }
  0x50   :  { %986 = vmatprep.subr.bf16.mxu0 %v1386_v6  ;;  %952 = vmatpush1.bf16.msra.mxu1 %v1405_v17  ;;  %v43_v22 = vsub.s32 0, %v1789_v21  ;;  %v47_v24 = vsub.s32 1, %v1789_v21  ;;  %v1413_v41 = vld [vmem:[%s1971_s3 + $0x4c] ss:$28 sps:$4 sm:$0xff]   ;;  %v1418_v45 = vld [vmem:[%s1971_s3 + $0x84] ss:$28 sps:$4 sm:$0xff]  }
  0x51   :  { %1003 = vmatprep.subr.bf16.mxu1 %v1408_v18  ;;  %v1414_v42 = vld [vmem:[%s1971_s3 + $0x210] ss:$28 sps:$4 sm:$0xff]   ;;  %v1419_v46 = vld [vmem:[%s1971_s3 + $0x248] ss:$28 sps:$4 sm:$0xff]   ;;  %v1416_v47 = vld [vmem:[%s1971_s3 + $0x80] ss:$28 sps:$4 sm:$0xff]  }
  0x52   :  { %v44_v25 = vrot.slane %v39_v23, %v43_v22  ;;  %v48_v26 = vrot.slane %v39_v23, %v47_v24  ;;  %v1415_v44 = vld [vmem:[%s1971_s3 + $0x50] ss:$28 sps:$4 sm:$0xff]   ;;  %v1420_v48 = vld [vmem:[%s1971_s3 + $0x88] ss:$28 sps:$4 sm:$0xff]   ;;  %v1423_v49 = vld [vmem:[%s1971_s3 + $0xbc] ss:$28 sps:$4 sm:$0xff]  }
  0x53   :  { %987 = vmatpush1.bf16.msra.mxu0 %v1384_v7  ;;  %v1424_v50 = vld [vmem:[%s1971_s3 + $0x280] ss:$28 sps:$4 sm:$0xff]   ;;  %v1421_v51 = vld [vmem:[%s1971_s3 + $0xb8] ss:$28 sps:$4 sm:$0xff]   ;;  %v1426_v55 = vld [vmem:[%s1971_s3 + $0xf0] ss:$28 sps:$4 sm:$0xff]  }
  0x54   :  { %988 = vmatprep.subr.bf16.mxu0 %v1392_v8  ;;  %v1425_v52 = vld [vmem:[%s1971_s3 + $0xc0] ss:$28 sps:$4 sm:$0xff]   ;;  %v1428_v53 = vld [vmem:[%s1971_s3 + $0xf4] ss:$28 sps:$4 sm:$0xff]   ;;  %v1433_v57 = vld [vmem:[%s1971_s3 + $0x12c] ss:$28 sps:$4 sm:$0xff]  }
  0x55   :  { %v1429_v54 = vld [vmem:[%s1971_s3 + $0x2b8] ss:$28 sps:$4 sm:$0xff]   ;;  %v1434_v58 = vld [vmem:[%s1971_s3 + $0x2f0] ss:$28 sps:$4 sm:$0xff]   ;;  %v1431_v59 = vld [vmem:[%s1971_s3 + $0x128] ss:$28 sps:$4 sm:$0xff]  }
  0x56   :  { %v1430_v56 = vld [vmem:[%s1971_s3 + $0xf8] ss:$28 sps:$4 sm:$0xff]   ;;  %v1435_v60 = vld [vmem:[%s1971_s3 + $0x130] ss:$28 sps:$4 sm:$0xff]   ;;  %v1438_v61 = vld [vmem:[%s1971_s3 + $0x164] ss:$28 sps:$4 sm:$0xff]  }
  0x57   :  { %989 = vmatpush1.bf16.msra.mxu0 %v1390_v9  ;;  %v1439_v62 = vld [vmem:[%s1971_s3 + $0x328] ss:$28 sps:$4 sm:$0xff]   ;;  %v1436_v63 = vld [vmem:[%s1971_s3 + $0x160] ss:$28 sps:$4 sm:$0xff]   ;;  %v1441_v3 = vld [vmem:[%s1971_s3 + $0x198] ss:$28 sps:$4 sm:$0xff]  }
  0x58   :  { %990 = vmatprep.subr.bf16.mxu0 %v1398_v11  ;;  %v1440_v0 = vld [vmem:[%s1971_s3 + $0x168] ss:$28 sps:$4 sm:$0xff]   ;;  %v1443_v1 = vld [vmem:[%s1971_s3 + $0x19c] ss:$28 sps:$4 sm:$0xff]   ;;  %v1448_v5 = vld [vmem:[%s1971_s3 + $0x1d4] ss:$28 sps:$4 sm:$0xff]  }
  0x59   :  { %v1444_v2 = vld [vmem:[%s1971_s3 + $0x360] ss:$28 sps:$4 sm:$0xff]   ;;  %v1446_v6 = vld [vmem:[%s1971_s3 + $0x1d0] ss:$28 sps:$4 sm:$0xff]   ;;  %v1449_v8 = vld [vmem:[%s1971_s3 + $0x208] ss:$28 sps:$4 sm:$0xff]  }
  0x5a   :  { %v1445_v4 = vld [vmem:[%s1971_s3 + $0x1a0] ss:$28 sps:$4 sm:$0xff]   ;;  %v1451_v7 = vld [vmem:[%s1971_s3 + $0x20c] ss:$28 sps:$4 sm:$0xff]   ;;  %v1460_v13 = vld [vmem:[%s1971_s3 + $0x2b4] ss:$28 sps:$4 sm:$0xff]  }
  0x5b   :  { %991 = vmatpush1.bf16.msra.mxu0 %v1396_v12  ;;  %v1454_v9 = vld [vmem:[%s1971_s3 + $0x244] ss:$28 sps:$4 sm:$0xff]   ;;  %v1457_v11 = vld [vmem:[%s1971_s3 + $0x27c] ss:$28 sps:$4 sm:$0xff]   ;;  %v1458_v14 = vld [vmem:[%s1971_s3 + $0x2b0] ss:$28 sps:$4 sm:$0xff]  }
  0x5c   :  { %992 = vmatprep.subr.bf16.mxu0 %v1404_v15  ;;  %v1452_v10 = vld [vmem:[%s1971_s3 + $0x240] ss:$28 sps:$4 sm:$0xff]   ;;  %v1455_v12 = vld [vmem:[%s1971_s3 + $0x278] ss:$28 sps:$4 sm:$0xff]   ;;  %v1463_v15 = vld [vmem:[%s1971_s3 + $0x2ec] ss:$28 sps:$4 sm:$0xff]  }
  0x5d   :  { %v1466_v17 = vld [vmem:[%s1971_s3 + $0x324] ss:$28 sps:$4 sm:$0xff]   ;;  %v1467_v20 = vld [vmem:[%s1971_s3 + $0x358] ss:$28 sps:$4 sm:$0xff]   ;;  %v320_v23 = vsub.s32 2, %v1789_v21 }
  0x5e   :  { %v1464_v18 = vld [vmem:[%s1971_s3 + $0x320] ss:$28 sps:$4 sm:$0xff]  }
  0x5f   :  { %993 = vmatpush1.bf16.msra.mxu0 %v1402_v16  ;;  %v1461_v16 = vld [vmem:[%s1971_s3 + $0x2e8] ss:$28 sps:$4 sm:$0xff]  }
  0x60   :  { %1262 = vmatprep.subr.bf16.mxu0 %v1409_v19  ;;  %v1469_v19 = vld [vmem:[%s1971_s3 + $0x35c] ss:$28 sps:$4 sm:$0xff]   ;;  %s1509_s3 = smov [#allocation2]  }
  0xf5   :  { %v165_v27 = vpop.f32.mrb[0].mxu0 }
  0xf6   :  { %v166_v28 = vadd.f32 %v165_v27, %v44_v25  ;;  %v167_v29 = vpop.f32.mrb[1].mxu0  ;;  %v308_v25 = vld [vmem:[%s1972_s4] sm:$0x7f]  ;;  %s1126_s4 = sshll.u32 %s1509_s3, 4  ;;  %s1127_s4 = int_to_ptr.vmem [resolvable:$true] %s1126_s4 }
  0xf7   :  { %v168_v30 = vadd.f32 %v167_v29, %v48_v26  ;;  %v169_v31 = vpop.f32.mrb[2].mxu0  ;;  %v324_v26 = vsub.s32 3, %v1789_v21  ;;  %v313_v27 = vrot.slane %v308_v25, %v43_v22  ;;  %v317_v29 = vrot.slane %v308_v25, %v47_v24  ;;  %s1484_s10 = scalar_lea.vmem %s1127_s4, 896  ;;  %p1489_p1 = scmp.lt.s32.totalorder %s1127_s4, %s1127_s4 }
  0xf8   :  { %vm172_vm0 = vcmp.gt.f32.partialorder %v166_v28, 0.0  ;;  %v174_v32 = vmul.f32 0.01, %v166_v28  ;;  %v170_v33 = vpop.f32.mrb[3].mxu0  ;;  %p1485_p0 = scmp.ne.s32.totalorder %s1127_s4, %s1484_s10  ;;  %p1490_p2 = scmp.lt.s32.totalorder %s1484_s10, %s1484_s10 }
  0xf9   :  { %vm173_vm1 = vcmp.gt.f32.partialorder %v168_v30, 0.0  ;;  %v175_v34 = vmul.f32 0.01, %v168_v30 }
  0xfa   :  { %v176_v35 = vsel %vm172_vm0, %v166_v28, %v174_v32  ;;  %v321_v28 = vrot.slane %v308_v25, %v320_v23  ;;  %p1491_p3 = por %p1490_p2, %p1489_p1 }
  0xfb   :  { %v177_v36 = vsel %vm173_vm1, %v168_v30, %v175_v34  ;;  %v1806_v40 = vpack.c.bf16 %v176_v35, %v176_v35  ;;  %v325_v30 = vrot.slane %v308_v25, %v324_v26 }
  0xfc   :  { %v179_v37 = vpack.c.bf16 %v177_v36, %v177_v36  ;;  %p1492_p4 = pnand %p1491_p3, %p1485_p0 }
  0xfe   :  { %953 = vmatprep.mubr.bf16.mxu1 %v179_v37  ;;  %994 = vmatprep.mubr.bf16.mxu0 %v179_v37 }
  0xff   :  { %954 = vmatmul.mubr.bf16.vlgmr.msra.gmra.mrb[0].mxu1 %v1806_v40  ;;  %995 = vmatmul.mubr.bf16.vlgmr.msra.gmra.mrb[4].mxu0 %v1806_v40 }
 0x100   :  { %1004 = vmatpush1.bf16.msra.mxu1 %v1406_v38  ;;  %1263 = vmatpush3.bf16.msra.mxu0 %v1410_v39 }
 0x101   :  { %1035 = vmatprep.mubr.bf16.mxu1 %v179_v37  ;;  %1076 = vmatprep.mubr.bf16.mxu0 %v179_v37 }
 0x102   :  { %1005 = vmatprep.subr.bf16.mxu1 %v1413_v41  ;;  %1264 = vmatprep.subr.bf16.mxu0 %v1414_v42 }
 0x104   :  { %1006 = vmatpush1.bf16.msra.mxu1 %v1411_v43  ;;  %1265 = vmatpush3.bf16.msra.mxu0 %v1415_v44 }
 0x105   :  { %1007 = vmatprep.subr.bf16.mxu1 %v1418_v45  ;;  %1266 = vmatprep.subr.bf16.mxu0 %v1419_v46 }
 0x108   :  { %1008 = vmatpush1.bf16.msra.mxu1 %v1416_v47  ;;  %1267 = vmatpush3.bf16.msra.mxu0 %v1420_v48 }
 0x109   :  { %1009 = vmatprep.subr.bf16.mxu1 %v1423_v49  ;;  %1268 = vmatprep.subr.bf16.mxu0 %v1424_v50 }
 0x10c   :  { %1010 = vmatpush1.bf16.msra.mxu1 %v1421_v51  ;;  %1269 = vmatpush3.bf16.msra.mxu0 %v1425_v52 }
 0x10d   :  { %1011 = vmatprep.subr.bf16.mxu1 %v1428_v53  ;;  %1270 = vmatprep.subr.bf16.mxu0 %v1429_v54 }
 0x110   :  { %1012 = vmatpush1.bf16.msra.mxu1 %v1426_v55  ;;  %1271 = vmatpush3.bf16.msra.mxu0 %v1430_v56 }
 0x111   :  { %1013 = vmatprep.subr.bf16.mxu1 %v1433_v57  ;;  %1272 = vmatprep.subr.bf16.mxu0 %v1434_v58  ;;  %v336_v57 = vsub.s32 6, %v1789_v21 }
 0x114   :  { %1014 = vmatpush1.bf16.msra.mxu1 %v1431_v59  ;;  %1273 = vmatpush3.bf16.msra.mxu0 %v1435_v60  ;;  %v337_v59 = vrot.slane %v308_v25, %v336_v57 }
 0x115   :  { %1015 = vmatprep.subr.bf16.mxu1 %v1438_v61  ;;  %1274 = vmatprep.subr.bf16.mxu0 %v1439_v62 }
 0x118   :  { %1016 = vmatpush1.bf16.msra.mxu1 %v1436_v63  ;;  %1275 = vmatpush3.bf16.msra.mxu0 %v1440_v0 }
 0x119   :  { %1017 = vmatprep.subr.bf16.mxu1 %v1443_v1  ;;  %1276 = vmatprep.subr.bf16.mxu0 %v1444_v2 }
 0x11c   :  { %1018 = vmatpush1.bf16.msra.mxu1 %v1441_v3  ;;  %1277 = vmatpush3.bf16.msra.mxu0 %v1445_v4 }
 0x11d   :  { %1019 = vmatprep.subr.bf16.mxu1 %v1448_v5  ;;  %v328_v5 = vsub.s32 4, %v1789_v21 }
 0x11f   :  { %1077 = vmatmul.mubr.bf16.vlgmr.msra.gmra.mrb[8].mxu0 %v1806_v40 }
 0x120   :  { %1020 = vmatpush1.bf16.msra.mxu1 %v1446_v6  ;;  %v332_v6 = vsub.s32 5, %v1789_v21 }
 0x121   :  { %1021 = vmatprep.subr.bf16.mxu1 %v1451_v7  ;;  %v329_v7 = vrot.slane %v308_v25, %v328_v5 }
 0x124   :  { %1022 = vmatpush1.bf16.msra.mxu1 %v1449_v8  ;;  %v333_v8 = vrot.slane %v308_v25, %v332_v6 }
 0x125   :  { %1023 = vmatprep.subr.bf16.mxu1 %v1454_v9 }
 0x128   :  { %1024 = vmatpush1.bf16.msra.mxu1 %v1452_v10 }
 0x129   :  { %1025 = vmatprep.subr.bf16.mxu1 %v1457_v11 }
 0x12c   :  { %1026 = vmatpush1.bf16.msra.mxu1 %v1455_v12 }
 0x12d   :  { %1027 = vmatprep.subr.bf16.mxu1 %v1460_v13 }
 0x130   :  { %1028 = vmatpush1.bf16.msra.mxu1 %v1458_v14 }
 0x131   :  { %1029 = vmatprep.subr.bf16.mxu1 %v1463_v15 }
 0x134   :  { %1030 = vmatpush1.bf16.msra.mxu1 %v1461_v16 }
 0x135   :  { %1031 = vmatprep.subr.bf16.mxu1 %v1466_v17 }
 0x138   :  { %1032 = vmatpush1.bf16.msra.mxu1 %v1464_v18 }
 0x139   :  { %1033 = vmatprep.subr.bf16.mxu1 %v1469_v19 }
 0x13c   :  { %1034 = vmatpush1.bf16.msra.mxu1 %v1467_v20 }
 0x13f   :  { %1036 = vmatmul.mubr.bf16.vlgmr.msra.gmra.mrb[4].mxu1 %v1806_v40 }
 0x1d2   :  { %v955_v31 = vpop.f32.mrb[0].mxu1  ;;  %v996_v32 = vpop.f32.mrb[4].mxu0 }
 0x1d3   :  { %v956_v33 = vadd.f32 %v955_v31, %v313_v27  ;;  %v997_v34 = vadd.f32 %v996_v32, %v321_v28  ;;  %v957_v35 = vpop.f32.mrb[1].mxu1  ;;  %v998_v36 = vpop.f32.mrb[5].mxu0 }
 0x1d4   :  { %v958_v37 = vadd.f32 %v957_v35, %v317_v29  ;;  %v999_v38 = vadd.f32 %v998_v36, %v325_v30  ;;  %v959_v39 = vpop.f32.mrb[2].mxu1  ;;  %v1000_v40 = vpop.f32.mrb[6].mxu0 }
 0x1d5   :  { %v1084_v41 = vmul.f32 0.5, %v956_v33  ;;  %v1086_v42 = vmul.f32 0.5, %v997_v34  ;;  %v960_v43 = vpop.f32.mrb[3].mxu1  ;;  %v1001_v44 = vpop.f32.mrb[7].mxu0 }
 0x1d6   :  { %v1085_v22 = vmul.f32 0.5, %v958_v37  ;;  %v1087_v45 = vmul.f32 0.5, %v999_v38 }
 0x1d7   :  { %1470 = vtanh.f32 %v1084_v41 }
 0x1d8   :  { %1472 = vtanh.f32 %v1086_v42 }
 0x1d9   :  { %1474 = vtanh.f32 %v1085_v22 }
 0x1da   :  { %1476 = vtanh.f32 %v1087_v45 }
 0x1e1   :  { %v1471_v24 = vpop.eup %1470 }
 0x1e2   :  { %v1473_v46 = vpop.eup %1472  ;;  %v1098_v47 = vmul.f32 0.5, %v1471_v24 }
 0x1e3   :  { %v1475_v48 = vpop.eup %1474  ;;  %v1100_v49 = vmul.f32 0.5, %v1473_v46 }
 0x1e4   :  { %v1477_v50 = vpop.eup %1476  ;;  %v1105_v51 = vadd.f32 0.5, %v1098_v47  ;;  %v1099_v52 = vmul.f32 0.5, %v1475_v48 }
 0x1e5   :  { %v1107_v53 = vadd.f32 0.5, %v1100_v49  ;;  %v1101_v54 = vmul.f32 0.5, %v1477_v50 }
 0x1e6   :  { %1112 = vst [vmem:[#allocation2] sm:$0xff] %v1105_v51  ;;  %v1106_v55 = vadd.f32 0.5, %v1099_v52 }
 0x1e7   :  { %1114 = vst [vmem:[#allocation2 + $0x10] sm:$0xff] %v1107_v53  ;;  %v1108_v56 = vadd.f32 0.5, %v1101_v54 }
 0x1e8   :  { %1113 = vst [vmem:[#allocation2 + $0x8] sm:$0xff] %v1106_v55 }
 0x1e9   :  { %1115 = vst [vmem:[#allocation2 + $0x18] sm:$0xff] %v1108_v56 }
 0x1f2   :  { %v1278_v58 = vpop.f32.mrb[8].mxu0 }
 0x1f3   :  { %v1279_v60 = vpop.f32.mrb[9].mxu0 }
 0x1f4   :  { %v1280_v61 = vadd.f32 %v1279_v60, %v1278_v58  ;;  %v1281_v62 = vpop.f32.mrb[10].mxu0 }
 0x1f5   :  { %v1282_v63 = vpop.f32.mrb[11].mxu0 }
 0x1f6   :  { %v1079_v0 = vadd.f32 %v1280_v61, %v337_v59 }
 0x1f8   :  { %v1090_v1 = vmul.f32 0.5, %v1079_v0 }
 0x1fa   :  { %1478 = vtanh.f32 %v1090_v1 }
 0x204   :  { %v1479_v2 = vpop.eup %1478 }
 0x205   :  { %v1104_v3 = vmul.f32 0.5, %v1479_v2 }
 0x207   :  { %v1111_v4 = vadd.f32 0.5, %v1104_v3 }
 0x209   :  { %1119 = vst.msk [vmem:[#allocation2 + $0x30] sm:$0xff] %vm1118_vm2, %v1111_v4 }
 0x212   :  { %v1037_v9 = vpop.f32.mrb[4].mxu1 }
 0x213   :  { %v1038_v10 = vadd.f32 %v1037_v9, %v329_v7  ;;  %v1039_v11 = vpop.f32.mrb[5].mxu1 }
 0x214   :  { %v1040_v12 = vadd.f32 %v1039_v11, %v333_v8  ;;  %v1041_v13 = vpop.f32.mrb[6].mxu1 }
 0x215   :  { %v1088_v14 = vmul.f32 0.5, %v1038_v10  ;;  %v1042_v15 = vpop.f32.mrb[7].mxu1 }
 0x216   :  { %v1089_v16 = vmul.f32 0.5, %v1040_v12 }
 0x217   :  { %1480 = vtanh.f32 %v1088_v14 }
 0x218   :  { %1482 = vtanh.f32 %v1089_v16 }
 0x221   :  { %v1481_v17 = vpop.eup %1480 }
 0x222   :  { %v1483_v18 = vpop.eup %1482  ;;  %v1102_v19 = vmul.f32 0.5, %v1481_v17 }
 0x223   :  { %v1103_v20 = vmul.f32 0.5, %v1483_v18 }
 0x224   :  { %v1109_v23 = vadd.f32 0.5, %v1102_v19 }
 0x225   :  { %v1110_v21 = vadd.f32 0.5, %v1103_v20 }
 0x226   :  { %1116 = vst [vmem:[#allocation2 + $0x20] sm:$0xff] %v1109_v23 }
 0x227   :  { %1117 = vst [vmem:[#allocation2 + $0x28] sm:$0xff] %v1110_v21 }
 0x228   :  { %1495 = shalt.err (!%p1492_p4)
}
 0x229   :  { %s1496_s13 = scalar_lea.hbm %s1973_s5, 896 }
 0x22a   :  { %p1497_p5 = scmp.ne.s32.totalorder %s1973_s5, %s1496_s13  ;;  %p1500_p6 = scmp.lt.u32.totalorder %s1496_s13, %s1973_s5 }
 0x22c   :  { %p1502_p7 = pnand %p1500_p6, %p1497_p5 }
 0x22e   :  { %1505 = shalt.err (!%p1502_p7)
}
 0x22f   :  { %1129 = dma.vmem_to_hbm [thread:$0]  %s1127_s4, 896, %s1973_s5, [#allocation3]  }
 0x230   :  { %1506 = dma.done.wait [#allocation3], 896  }
 0x231   :  { %1507 = vsyncadd [#allocation3], 4294966400 }
 0x232   :  { %1133 = vsyncpa [#allocation3], 1 }

</bundles_post_ra>
